<compile_context>
chip_gen: v7x
topology: tpu7x:2x2x1
jax: 0.10.0
libtpu: 0.0.40
codegen_flags: <defaults>
</compile_context>

<pallas_src>
import functools

import numpy as np
import jax
import jax.numpy as jnp
from jax.experimental import pallas as pl
from jax.experimental.pallas import tpu as pltpu


# ----------------------------------------------------------------------------
# Pallas kernel: conv1 -> relu -> conv2 -> relu -> linear(+turn) -> relu ->
# linear, all convs pre-lowered to dense matmuls.  Shapes per grid step:
#   board (bt,128) bf16, turn (bt,1) f32, out (bt,7) f32.
# ----------------------------------------------------------------------------
def qnet_kernel(board_ref, turn_ref, w1_ref, b1_ref, w2_ref, b2_ref,
                w3_ref, w3t_ref, b3_ref, w4_ref, b4_ref, out_ref):
    board = board_ref[...]                       # (bt, 128) bf16 (cols 84+ are 0)
    turn = turn_ref[...]                         # (bt, 1)   f32

    # Conv2d(2, 32, 4) as dense matmul, + bias + ReLU
    h1 = jnp.dot(board, w1_ref[...], preferred_element_type=jnp.float32)
    h1 = jnp.maximum(h1 + b1_ref[...], 0.0)      # (bt, 384) f32

    # Conv2d(32, 16, (3,2)) as dense matmul (N padded 48->128), + bias + ReLU
    h2 = jnp.dot(h1.astype(jnp.bfloat16), w2_ref[...],
                 preferred_element_type=jnp.float32)
    h2 = jnp.maximum(h2 + b2_ref[...], 0.0)      # (bt, 128) f32

    # Linear(49, 20) split as (features @ W) + turn * w_turn (padded 20->128)
    h3 = jnp.dot(h2.astype(jnp.bfloat16), w3_ref[...],
                 preferred_element_type=jnp.float32)
    h3 = jnp.maximum(h3 + turn * w3t_ref[...] + b3_ref[...], 0.0)  # (bt, 128)

    # Linear(20, 7)  (K padded 20->128, N kept narrow at 7)
    out = jnp.dot(h3.astype(jnp.bfloat16), w4_ref[...],
                  preferred_element_type=jnp.float32)
    out_ref[...] = out + b4_ref[...]             # (bt, 7)


# ----------------------------------------------------------------------------
# Host-side (run ONCE): dense im2col weights for the two tiny VALID convs,
# plus zero-padding so every kernel operand is lane-aligned.
# ----------------------------------------------------------------------------
def conv_to_dense(W, in_hw):
    """W: (OC, IC, KH, KW) conv weight -> dense (IC*IH*IW, OC*OH*OW) matmul."""
    W = np.asarray(W, dtype=np.float32)
    OC, IC, KH, KW = W.shape
    IH, IW = in_hw
    OH, OW = IH - KH + 1, IW - KW + 1
    D = np.zeros((IC * IH * IW, OC * OH * OW), dtype=np.float32)
    for oc in range(OC):
        for ic in range(IC):
            for kh in range(KH):
                for kw in range(KW):
                    for oh in range(OH):
                        for ow in range(OW):
                            row = ic * IH * IW + (oh + kh) * IW + (ow + kw)
                            col = oc * OH * OW + oh * OW + ow
                            D[row, col] = W[oc, ic, kh, kw]
    return D, (OH, OW)


def prepare_params(params):
    """Build the padded/bf16 dense operand set.  Call once, reuse every step."""
    W1, b1, W2, b2, W3, b3, W4, b4 = (np.asarray(p, np.float32) for p in params)

    W1d, (oh1, ow1) = conv_to_dense(W1, (6, 7))           # (84, 384)
    W2d, (oh2, ow2) = conv_to_dense(W2, (oh1, ow1))       # (384, 48)
    b1d = np.repeat(b1, oh1 * ow1)[None, :]               # (1, 384)
    b2d = np.repeat(b2, oh2 * ow2)[None, :]               # (1, 48)
    n_feat = W2d.shape[1]                                 # 48

    # Pad conv1 K: 84 -> 128 (board is zero-padded to 128 lanes in the wrapper)
    W1p = np.zeros((128, W1d.shape[1]), np.float32); W1p[:84, :] = W1d
    # Pad conv2 N: 48 -> 128 so h2 is lane-dense
    W2p = np.zeros((W2d.shape[0], 128), np.float32); W2p[:, :n_feat] = W2d
    b2p = np.zeros((1, 128), np.float32);            b2p[:, :n_feat] = b2d

    # Linear(49, 20): split feature part / turn column, pad K 48->128, N 20->128
    W3a = np.zeros((128, 128), np.float32); W3a[:n_feat, :20] = W3.T[:n_feat, :]
    W3t = np.zeros((1, 128), np.float32);   W3t[0, :20] = W3[:, n_feat]
    b3p = np.zeros((1, 128), np.float32);   b3p[0, :20] = b3

    # Linear(20, 7): pad K 20 -> 128, keep N = 7
    W4p = np.zeros((128, 7), np.float32);   W4p[:20, :] = W4.T
    b4p = b4[None, :]

    return (jnp.asarray(W1p, jnp.bfloat16), jnp.asarray(b1d),
            jnp.asarray(W2p, jnp.bfloat16), jnp.asarray(b2p),
            jnp.asarray(W3a, jnp.bfloat16), jnp.asarray(W3t),
            jnp.asarray(b3p),
            jnp.asarray(W4p, jnp.bfloat16), jnp.asarray(b4p))


def _round_up(n, m):
    return ((n + m - 1) // m) * m


# ----------------------------------------------------------------------------
# Jitted wrapper: batch-tiled pallas_call with resident weights.
# ----------------------------------------------------------------------------
@functools.partial(jax.jit, static_argnames=("b_tile",))
def qnet_forward(x, prepared, b_tile=1024):
    (W1p, b1d, W2p, b2p, W3a, W3t, b3p, W4p, b4p) = prepared
    B = x.shape[0]

    # Batch tile: multiple of 16 (bf16 sublane packing), capped by b_tile so a
    # step's footprint stays well inside v7x's 64 MiB VMEM.
    bt = min(b_tile, _round_up(B, 16))
    B_pad = _round_up(B, bt)
    grid = (B_pad // bt,)

    # Operand prep fuses into the HBM load under jit (no in-kernel lane slices).
    board = jnp.pad(x[:, :84].astype(jnp.bfloat16),
                    ((0, B_pad - B), (0, 128 - 84)))       # (B_pad, 128) bf16
    turn = jnp.pad(x[:, 84:85], ((0, B_pad - B), (0, 0)))  # (B_pad, 1)   f32

    batch_spec = lambda shape: pl.BlockSpec(shape, lambda i: (i, 0))
    const_spec = lambda shape: pl.BlockSpec(shape, lambda i: (0, 0))

    in_specs = [
        batch_spec((bt, 128)),      # board
        batch_spec((bt, 1)),        # turn
        const_spec((128, 384)),     # W1 (im2col, K-padded)
        const_spec((1, 384)),       # b1
        const_spec((384, 128)),     # W2 (im2col, N-padded)
        const_spec((1, 128)),       # b2
        const_spec((128, 128)),     # W3 feature part (K/N-padded)
        const_spec((1, 128)),       # W3 turn column
        const_spec((1, 128)),       # b3
        const_spec((128, 7)),       # W4 (K-padded)
        const_spec((1, 7)),         # b4
    ]
    out_specs = batch_spec((bt, 7))

    weight_bytes = sum(int(np.prod(w.shape)) * w.dtype.itemsize for w in prepared)
    cost = pl.CostEstimate(
        flops=2 * B_pad * (128 * 384 + 384 * 128 + 128 * 128 + 128 * 7),
        transcendentals=0,
        bytes_accessed=B_pad * (128 * 2 + 4 + 7 * 4) + weight_bytes,
    )

    out = pl.pallas_call(
        qnet_kernel,
        out_shape=jax.ShapeDtypeStruct((B_pad, 7), jnp.float32),
        grid=grid,
        in_specs=in_specs,
        out_specs=out_specs,
        cost_estimate=cost,
        compiler_params=pltpu.CompilerParams(
            dimension_semantics=("parallel",)),
    )(board, turn, W1p, b1d, W2p, b2p, W3a, W3t, b3p, W4p, b4p)

    return out[:B]


# ----------------------------------------------------------------------------
# Pure-JAX reference (lax.conv, f32) for correctness checking.
# ----------------------------------------------------------------------------
def qnet_reference(x, params):
    (W1, b1, W2, b2, W3, b3, W4, b4) = params
    B = x.shape[0]
    board = x[:, :84].reshape(B, 2, 6, 7)
    turn = x[:, 84:85]
    dn = ("NCHW", "OIHW", "NCHW")
    h = jax.lax.conv_general_dilated(board, W1, (1, 1), "VALID",
                                     dimension_numbers=dn)
    h = jnp.maximum(h + b1[None, :, None, None], 0.0)
    h = jax.lax.conv_general_dilated(h, W2, (1, 1), "VALID",
                                     dimension_numbers=dn)
    h = jnp.maximum(h + b2[None, :, None, None], 0.0)
    feat = h.reshape(B, -1)
    z = jnp.concatenate([feat, turn], axis=1)
    z = jnp.maximum(z @ W3.T + b3, 0.0)
    return z @ W4.T + b4


if __name__ == "__main__":
    key = jax.random.PRNGKey(0)
    ks = jax.random.split(key, 9)

    # Deterministic synthetic parameters (same shapes as the nn.Module)
    W1 = jax.random.normal(ks[0], (32, 2, 4, 4), jnp.float32) * 0.1
    b1 = jax.random.normal(ks[1], (32,), jnp.float32) * 0.1
    W2 = jax.random.normal(ks[2], (16, 32, 3, 2), jnp.float32) * 0.1
    b2 = jax.random.normal(ks[3], (16,), jnp.float32) * 0.1
    W3 = jax.random.normal(ks[4], (20, 49), jnp.float32) * 0.1
    b3 = jax.random.normal(ks[5], (20,), jnp.float32) * 0.1
    W4 = jax.random.normal(ks[6], (7, 20), jnp.float32) * 0.1
    b4 = jax.random.normal(ks[7], (7,), jnp.float32) * 0.1
    params = (W1, b1, W2, b2, W3, b3, W4, b4)

    # Host-side weight lowering runs exactly once.
    prepared = prepare_params(params)

    # Example input: batch of 2 Connect-4 states (84 board values + 1 turn)
    x = jax.random.normal(ks[8], (2, 85), jnp.float32)

    out = jax.block_until_ready(qnet_forward(x, prepared))

    ref = jax.block_until_ready(qnet_reference(x, params))
    # bf16 matmul operands -> looser tolerance than the pure-f32 version.
    np.testing.assert_allclose(np.asarray(out), np.asarray(ref),
                               rtol=2e-2, atol=2e-2)
    print("KERNEL_OK")
</pallas_src>

<mosaic_0001>
module attributes {stable_mosaic.version = 11 : i64} {
  func.func @qnet_kernel(%arg0: i32, %arg1: memref<16x128xbf16, #tpu.memory_space<vmem>>, %arg2: memref<16x1xf32, #tpu.memory_space<vmem>>, %arg3: memref<128x384xbf16, #tpu.memory_space<vmem>>, %arg4: memref<1x384xf32, #tpu.memory_space<vmem>>, %arg5: memref<384x128xbf16, #tpu.memory_space<vmem>>, %arg6: memref<1x128xf32, #tpu.memory_space<vmem>>, %arg7: memref<128x128xbf16, #tpu.memory_space<vmem>>, %arg8: memref<1x128xf32, #tpu.memory_space<vmem>>, %arg9: memref<1x128xf32, #tpu.memory_space<vmem>>, %arg10: memref<128x7xbf16, #tpu.memory_space<vmem>>, %arg11: memref<1x7xf32, #tpu.memory_space<vmem>>, %arg12: memref<16x7xf32, #tpu.memory_space<vmem>>) attributes {dimension_semantics = [#tpu.dimension_semantics<parallel>], iteration_bounds = array<i64: 1>, scalar_prefetch = 0 : i64, scratch_operands = 0 : i64, tpu.core_type = #tpu.core_type<tc>, window_params = [{transform_indices = @transform_0, window_bounds = array<i64: 16, 128>}, {transform_indices = @transform_1, window_bounds = array<i64: 16, 1>}, {pipeline_mode = #tpu.pipeline_mode<synchronous>, transform_indices = @transform_2, window_bounds = array<i64: 128, 384>}, {pipeline_mode = #tpu.pipeline_mode<synchronous>, transform_indices = @transform_3, window_bounds = array<i64: 1, 384>}, {pipeline_mode = #tpu.pipeline_mode<synchronous>, transform_indices = @transform_4, window_bounds = array<i64: 384, 128>}, {pipeline_mode = #tpu.pipeline_mode<synchronous>, transform_indices = @transform_5, window_bounds = array<i64: 1, 128>}, {pipeline_mode = #tpu.pipeline_mode<synchronous>, transform_indices = @transform_6, window_bounds = array<i64: 128, 128>}, {pipeline_mode = #tpu.pipeline_mode<synchronous>, transform_indices = @transform_7, window_bounds = array<i64: 1, 128>}, {pipeline_mode = #tpu.pipeline_mode<synchronous>, transform_indices = @transform_8, window_bounds = array<i64: 1, 128>}, {pipeline_mode = #tpu.pipeline_mode<synchronous>, transform_indices = @transform_9, window_bounds = array<i64: 128, 7>}, {pipeline_mode = #tpu.pipeline_mode<synchronous>, transform_indices = @transform_10, window_bounds = array<i64: 1, 7>}, {transform_indices = @transform_11, window_bounds = array<i64: 16, 7>}]} {
    %c0 = arith.constant 0 : index
    %c0_0 = arith.constant 0 : index
    %0 = vector.load %arg1[%c0, %c0_0] : memref<16x128xbf16, #tpu.memory_space<vmem>>, vector<16x128xbf16>
    %c0_1 = arith.constant 0 : index
    %c0_2 = arith.constant 0 : index
    %1 = vector.load %arg2[%c0_1, %c0_2] : memref<16x1xf32, #tpu.memory_space<vmem>>, vector<16x1xf32>
    %c0_3 = arith.constant 0 : index
    %c0_4 = arith.constant 0 : index
    %2 = vector.load %arg3[%c0_3, %c0_4] : memref<128x384xbf16, #tpu.memory_space<vmem>>, vector<128x384xbf16>
    %cst = arith.constant dense<0.000000e+00> : vector<16x384xf32>
    %3 = tpu.matmul %0, %2, %cst {dimension_numbers = #tpu.dot_dimension_numbers<[1], [0], [0], [1], [0, 0, 1, 1], [], []>} : vector<16x128xbf16>, vector<128x384xbf16>, vector<16x384xf32> -> vector<16x384xf32>
    %c0_5 = arith.constant 0 : index
    %c0_6 = arith.constant 0 : index
    %4 = vector.load %arg4[%c0_5, %c0_6] : memref<1x384xf32, #tpu.memory_space<vmem>>, vector<1x384xf32>
    %5 = vector.broadcast %4 : vector<1x384xf32> to vector<16x384xf32>
    %6 = arith.addf %3, %5 : vector<16x384xf32>
    %cst_7 = arith.constant 0.000000e+00 : f32
    %7 = vector.broadcast %cst_7 : f32 to vector<16x384xf32>
    %8 = arith.maximumf %6, %7 : vector<16x384xf32>
    %9 = arith.truncf %8 : vector<16x384xf32> to vector<16x384xbf16>
    %c0_8 = arith.constant 0 : index
    %c0_9 = arith.constant 0 : index
    %10 = vector.load %arg5[%c0_8, %c0_9] : memref<384x128xbf16, #tpu.memory_space<vmem>>, vector<384x128xbf16>
    %cst_10 = arith.constant dense<0.000000e+00> : vector<16x128xf32>
    %11 = tpu.matmul %9, %10, %cst_10 {dimension_numbers = #tpu.dot_dimension_numbers<[1], [0], [0], [1], [0, 0, 1, 1], [], []>} : vector<16x384xbf16>, vector<384x128xbf16>, vector<16x128xf32> -> vector<16x128xf32>
    %c0_11 = arith.constant 0 : index
    %c0_12 = arith.constant 0 : index
    %12 = vector.load %arg6[%c0_11, %c0_12] : memref<1x128xf32, #tpu.memory_space<vmem>>, vector<1x128xf32>
    %13 = vector.broadcast %12 : vector<1x128xf32> to vector<16x128xf32>
    %14 = arith.addf %11, %13 : vector<16x128xf32>
    %cst_13 = arith.constant 0.000000e+00 : f32
    %15 = vector.broadcast %cst_13 : f32 to vector<16x128xf32>
    %16 = arith.maximumf %14, %15 : vector<16x128xf32>
    %17 = arith.truncf %16 : vector<16x128xf32> to vector<16x128xbf16>
    %c0_14 = arith.constant 0 : index
    %c0_15 = arith.constant 0 : index
    %18 = vector.load %arg7[%c0_14, %c0_15] : memref<128x128xbf16, #tpu.memory_space<vmem>>, vector<128x128xbf16>
    %cst_16 = arith.constant dense<0.000000e+00> : vector<16x128xf32>
    %19 = tpu.matmul %17, %18, %cst_16 {dimension_numbers = #tpu.dot_dimension_numbers<[1], [0], [0], [1], [0, 0, 1, 1], [], []>} : vector<16x128xbf16>, vector<128x128xbf16>, vector<16x128xf32> -> vector<16x128xf32>
    %c0_17 = arith.constant 0 : index
    %c0_18 = arith.constant 0 : index
    %20 = vector.load %arg8[%c0_17, %c0_18] : memref<1x128xf32, #tpu.memory_space<vmem>>, vector<1x128xf32>
    %21 = vector.broadcast %1 : vector<16x1xf32> to vector<16x128xf32>
    %22 = vector.broadcast %20 : vector<1x128xf32> to vector<16x128xf32>
    %23 = arith.mulf %21, %22 : vector<16x128xf32>
    %24 = arith.addf %19, %23 : vector<16x128xf32>
    %c0_19 = arith.constant 0 : index
    %c0_20 = arith.constant 0 : index
    %25 = vector.load %arg9[%c0_19, %c0_20] : memref<1x128xf32, #tpu.memory_space<vmem>>, vector<1x128xf32>
    %26 = vector.broadcast %25 : vector<1x128xf32> to vector<16x128xf32>
    %27 = arith.addf %24, %26 : vector<16x128xf32>
    %cst_21 = arith.constant 0.000000e+00 : f32
    %28 = vector.broadcast %cst_21 : f32 to vector<16x128xf32>
    %29 = arith.maximumf %27, %28 : vector<16x128xf32>
    %30 = arith.truncf %29 : vector<16x128xf32> to vector<16x128xbf16>
    %c0_22 = arith.constant 0 : index
    %c0_23 = arith.constant 0 : index
    %31 = vector.load %arg10[%c0_22, %c0_23] : memref<128x7xbf16, #tpu.memory_space<vmem>>, vector<128x7xbf16>
    %cst_24 = arith.constant dense<0.000000e+00> : vector<16x7xf32>
    %32 = tpu.matmul %30, %31, %cst_24 {dimension_numbers = #tpu.dot_dimension_numbers<[1], [0], [0], [1], [0, 0, 1, 1], [], []>} : vector<16x128xbf16>, vector<128x7xbf16>, vector<16x7xf32> -> vector<16x7xf32>
    %c0_25 = arith.constant 0 : index
    %c0_26 = arith.constant 0 : index
    %33 = vector.load %arg11[%c0_25, %c0_26] : memref<1x7xf32, #tpu.memory_space<vmem>>, vector<1x7xf32>
    %34 = vector.broadcast %33 : vector<1x7xf32> to vector<16x7xf32>
    %35 = arith.addf %32, %34 : vector<16x7xf32>
    %c0_27 = arith.constant 0 : index
    %c0_28 = arith.constant 0 : index
    %36 = vector.load %arg12[%c0_27, %c0_28] : memref<16x7xf32, #tpu.memory_space<vmem>>, vector<16x7xf32>
    tpu.vector_store %arg12[%c0_27, %c0_28], %35 {strides = array<i32>} : memref<16x7xf32, #tpu.memory_space<vmem>>, vector<16x7xf32>,
    return
  }
  func.func @transform_0(%arg0: i32) -> (i32, i32) {
    %c0_i32 = arith.constant 0 : i32
    %c0_i32_0 = arith.constant 0 : i32
    return %arg0, %c0_i32 : i32, i32
  }
  func.func @transform_1(%arg0: i32) -> (i32, i32) {
    %c0_i32 = arith.constant 0 : i32
    %c0_i32_0 = arith.constant 0 : i32
    return %arg0, %c0_i32 : i32, i32
  }
  func.func @transform_2(%arg0: i32) -> (i32, i32) {
    %c0_i32 = arith.constant 0 : i32
    %c0_i32_0 = arith.constant 0 : i32
    %c0_i32_1 = arith.constant 0 : i32
    return %c0_i32, %c0_i32_0 : i32, i32
  }
  func.func @transform_3(%arg0: i32) -> (i32, i32) {
    %c0_i32 = arith.constant 0 : i32
    %c0_i32_0 = arith.constant 0 : i32
    %c0_i32_1 = arith.constant 0 : i32
    return %c0_i32, %c0_i32_0 : i32, i32
  }
  func.func @transform_4(%arg0: i32) -> (i32, i32) {
    %c0_i32 = arith.constant 0 : i32
    %c0_i32_0 = arith.constant 0 : i32
    %c0_i32_1 = arith.constant 0 : i32
    return %c0_i32, %c0_i32_0 : i32, i32
  }
  func.func @transform_5(%arg0: i32) -> (i32, i32) {
    %c0_i32 = arith.constant 0 : i32
    %c0_i32_0 = arith.constant 0 : i32
    %c0_i32_1 = arith.constant 0 : i32
    return %c0_i32, %c0_i32_0 : i32, i32
  }
  func.func @transform_6(%arg0: i32) -> (i32, i32) {
    %c0_i32 = arith.constant 0 : i32
    %c0_i32_0 = arith.constant 0 : i32
    %c0_i32_1 = arith.constant 0 : i32
    return %c0_i32, %c0_i32_0 : i32, i32
  }
  func.func @transform_7(%arg0: i32) -> (i32, i32) {
    %c0_i32 = arith.constant 0 : i32
    %c0_i32_0 = arith.constant 0 : i32
    %c0_i32_1 = arith.constant 0 : i32
    return %c0_i32, %c0_i32_0 : i32, i32
  }
  func.func @transform_8(%arg0: i32) -> (i32, i32) {
    %c0_i32 = arith.constant 0 : i32
    %c0_i32_0 = arith.constant 0 : i32
    %c0_i32_1 = arith.constant 0 : i32
    return %c0_i32, %c0_i32_0 : i32, i32
  }
  func.func @transform_9(%arg0: i32) -> (i32, i32) {
    %c0_i32 = arith.constant 0 : i32
    %c0_i32_0 = arith.constant 0 : i32
    %c0_i32_1 = arith.constant 0 : i32
    return %c0_i32, %c0_i32_0 : i32, i32
  }
  func.func @transform_10(%arg0: i32) -> (i32, i32) {
    %c0_i32 = arith.constant 0 : i32
    %c0_i32_0 = arith.constant 0 : i32
    %c0_i32_1 = arith.constant 0 : i32
    return %c0_i32, %c0_i32_0 : i32, i32
  }
  func.func @transform_11(%arg0: i32) -> (i32, i32) {
    %c0_i32 = arith.constant 0 : i32
    %c0_i32_0 = arith.constant 0 : i32
    return %arg0, %c0_i32 : i32, i32
  }
}

</mosaic_0001>

<bundles_post_ra>
// kernel: qnet_forward.1
= control target key start
LH: loop header
LB: loop body
LE: loop exit
PB: predicated region body
PF: predicated region fallthrough
CT: control target
= control target key end

     0   :  { %16 = vsyncpa [#allocation3], 0  ;;  %s1437_s0 = inlined_call_operand.vmem [shape: bf16[16,128], index: 0, kind: input, shape index: {}]   ;;  %s1438_s1 = inlined_call_operand.vmem [shape: f32[16,1], index: 1, kind: input, shape index: {}]   ;;  %s1439_s2 = inlined_call_operand.hbm [shape: bf16[128,384], index: 2, kind: input, shape index: {}]   ;;  %s1440_s3 = inlined_call_operand.vmem [shape: f32[1,384], index: 3, kind: input, shape index: {}]   ;;  %s1441_s4 = inlined_call_operand.hbm [shape: bf16[384,128], index: 4, kind: input, shape index: {}]   ;;  %s1442_s5 = inlined_call_operand.vmem [shape: f32[1,128], index: 5, kind: input, shape index: {}]   ;;  %s1443_s6 = inlined_call_operand.vmem [shape: bf16[128,128], index: 6, kind: input, shape index: {}]   ;;  %s1444_s7 = inlined_call_operand.vmem [shape: f32[1,128], index: 7, kind: input, shape index: {}]   ;;  %s1445_s8 = inlined_call_operand.vmem [shape: f32[1,128], index: 8, kind: input, shape index: {}]   ;;  %s1446_s9 = inlined_call_operand.vmem [shape: bf16[128,7], index: 9, kind: input, shape index: {}]   ;;  %s1447_s10 = inlined_call_operand.vmem [shape: f32[1,7], index: 10, kind: input, shape index: {}]   ;;  %s1448_s11 = inlined_call_operand.vmem [shape: f32[16,7], index: 11, kind: output, shape index: {}]  }
   0x1   :  { %17 = vsyncpa [#allocation5], 0  ;;  %s1226_s17 = smov [#allocation2]   ;;  %s1178_s21 = scalar_lea.hbm %s1439_s2, 3072 }
   0x2   :  { %s27_s18 = sshll.u32 %s1226_s17, 4  ;;  %p1179_p0 = scmp.ne.s32.totalorder %s1439_s2, %s1178_s21  ;;  %s28_s18 = int_to_ptr.vmem [resolvable:$true] %s27_s18 }
   0x3   :  { %p1182_p1 = scmp.lt.u32.totalorder %s1178_s21, %s1439_s2 }
   0x5   :  { %p1184_p2 = pnand %p1182_p1, %p1179_p0 }
   0x7   :  { %1187 = shalt.err (!%p1184_p2)
}
   0x8   :  { %s1188_s26 = scalar_lea.vmem %s28_s18, 3072  ;;  %p1193_p4 = scmp.lt.s32.totalorder %s28_s18, %s28_s18 }
   0x9   :  { %p1189_p3 = scmp.ne.s32.totalorder %s28_s18, %s1188_s26  ;;  %p1194_p5 = scmp.lt.s32.totalorder %s1188_s26, %s1188_s26 }
   0xb   :  { %p1195_p6 = por %p1194_p5, %p1193_p4 }
   0xd   :  { %p1196_p7 = pnand %p1195_p6, %p1189_p3 }
   0xf   :  { %1199 = shalt.err (!%p1196_p7)
}
  0x10   :  { %s1227_s27 = smov 192   ;;  %s1228_s28 = smov 12  }
  0x11   :  { %33 = dma.hbm_to_vmem [thread:$0]  %s1439_s2, 3072, %s28_s18, [#allocation3], %s1227_s27, %s1227_s27, %s1228_s28  }
  0x12   :  { %s1229_s12 = smov [#allocation4]   ;;  %s1200_s16 = scalar_lea.hbm %s1441_s4, 3072 }
  0x13   :  { %s41_s13 = sshll.u32 %s1229_s12, 4  ;;  %p1201_p8 = scmp.ne.s32.totalorder %s1441_s4, %s1200_s16  ;;  %s42_s13 = int_to_ptr.vmem [resolvable:$true] %s41_s13 }
  0x14   :  { %p1204_p9 = scmp.lt.u32.totalorder %s1200_s16, %s1441_s4 }
  0x16   :  { %p1206_p10 = pnand %p1204_p9, %p1201_p8 }
  0x18   :  { %1209 = shalt.err (!%p1206_p10)
}
  0x19   :  { %s1210_s22 = scalar_lea.vmem %s42_s13, 3072  ;;  %p1215_p12 = scmp.lt.s32.totalorder %s42_s13, %s42_s13 }
  0x1a   :  { %p1211_p11 = scmp.ne.s32.totalorder %s42_s13, %s1210_s22  ;;  %p1216_p13 = scmp.lt.s32.totalorder %s1210_s22, %s1210_s22 }
  0x1c   :  { %p1217_p0 = por %p1216_p13, %p1215_p12 }
  0x1e   :  { %p1218_p1 = pnand %p1217_p0, %p1211_p11 }
  0x20   :  { %1221 = shalt.err (!%p1218_p1)
}
  0x21   :  { %s1230_s2 = smov 64   ;;  %s1231_s18 = smov 4  }
  0x22   :  { %47 = dma.hbm_to_vmem [thread:$0]  %s1441_s4, 3072, %s42_s13, [#allocation5], %s1230_s2, %s1230_s2, %s1231_s18  }
  0x23   :  { %1222 = dma.done.wait [#allocation3], 3072  }
  0x24   :  { %1223 = vsyncadd [#allocation3], 4294964224 }
  0x25   :  { %1224 = dma.done.wait [#allocation5], 3072  }
  0x26   :  { %1225 = vsyncadd [#allocation5], 4294964224  ;;  %v1232_v0 = vmov 0.0   ;;  %v1233_v1 = vmov 0   ;;  %vm1234_vm0 = vmmov 0   ;;  %v1138_v26 = vld [vmem:[#allocation4 + $0x40] sm:$0xff]   ;;  %v105_v51 = vlaneseq }
  0x27   :  { %1015 = vmatprep.subr.bf16.mxu1 %v1232_v0  ;;  %286 = vmatprep.mubr.bf16.mxu0 %v1233_v1  ;;  %v1105_v2 = vld [vmem:[#allocation2 + $0x4] ss:$12 sps:$4 sm:$0xff]   ;;  %v1107_v3 = vld [vmem:[#allocation2] ss:$12 sps:$4 sm:$0xff]   ;;  %v1108_v4 = vld [vmem:[#allocation2 + $0x8] ss:$12 sps:$4 sm:$0xff]  }
  0x28   :  { %1031 = vmatprep.mubr.msk.bf16.mxu1 %vm1234_vm0, %v1232_v0  ;;  %1104 = vset.pattern.permute.xlu0 %v1233_v1  ;;  %v1109_v5 = vld [vmem:[#allocation2 + $0x1c] ss:$12 sps:$4 sm:$0xff]   ;;  %v1111_v6 = vld [vmem:[#allocation2 + $0x18] ss:$12 sps:$4 sm:$0xff]   ;;  %v1112_v7 = vld [vmem:[#allocation2 + $0x20] ss:$12 sps:$4 sm:$0xff]  }
  0x29   :  { %254 = vmatprep.subr.bf16.mxu0 %v1105_v2  ;;  %1016 = vmatpush3.bf16.msra.mxu1 %v1108_v4  ;;  %v1113_v8 = vld [vmem:[#allocation2 + $0x34] ss:$12 sps:$4 sm:$0xff]   ;;  %v1115_v9 = vld [vmem:[#allocation2 + $0x30] ss:$12 sps:$4 sm:$0xff]   ;;  %v1116_v10 = vld [vmem:[#allocation2 + $0x38] ss:$12 sps:$4 sm:$0xff]  }
  0x2a   :  { %255 = vmatpush1.bf16.msra.mxu0 %v1107_v3  ;;  %1017 = vmatprep.subr.bf16.mxu1 %v1232_v0  ;;  %v1117_v11 = vld [vmem:[#allocation2 + $0x4c] ss:$12 sps:$4 sm:$0xff]   ;;  %v1119_v12 = vld [vmem:[#allocation2 + $0x48] ss:$12 sps:$4 sm:$0xff]   ;;  %v1120_v13 = vld [vmem:[#allocation2 + $0x50] ss:$12 sps:$4 sm:$0xff]  }
  0x2b   :  { %256 = vmatprep.subr.bf16.mxu0 %v1109_v5  ;;  %v1121_v14 = vld [vmem:[#allocation2 + $0x64] ss:$12 sps:$4 sm:$0xff]   ;;  %v1123_v15 = vld [vmem:[#allocation2 + $0x60] ss:$12 sps:$4 sm:$0xff]   ;;  %v1124_v16 = vld [vmem:[#allocation2 + $0x68] ss:$12 sps:$4 sm:$0xff]  }
  0x2c   :  { %v1125_v17 = vld [vmem:[#allocation2 + $0x7c] ss:$12 sps:$4 sm:$0xff]   ;;  %v1127_v18 = vld [vmem:[#allocation2 + $0x78] ss:$12 sps:$4 sm:$0xff]   ;;  %v1128_v19 = vld [vmem:[#allocation2 + $0x80] ss:$12 sps:$4 sm:$0xff]  }
  0x2d   :  { %1018 = vmatpush3.bf16.msra.mxu1 %v1112_v7  ;;  %v1129_v20 = vld [vmem:[#allocation2 + $0x94] ss:$12 sps:$4 sm:$0xff]   ;;  %v1131_v21 = vld [vmem:[#allocation2 + $0x90] ss:$12 sps:$4 sm:$0xff]   ;;  %v1132_v22 = vld [vmem:[#allocation2 + $0x98] ss:$12 sps:$4 sm:$0xff]  }
  0x2e   :  { %257 = vmatpush1.bf16.msra.mxu0 %v1111_v6  ;;  %1019 = vmatprep.subr.bf16.mxu1 %v1232_v0  ;;  %v1133_v23 = vld [vmem:[#allocation2 + $0xac] ss:$12 sps:$4 sm:$0xff]   ;;  %v1135_v24 = vld [vmem:[#allocation2 + $0xa8] ss:$12 sps:$4 sm:$0xff]   ;;  %v1136_v25 = vld [vmem:[#allocation2 + $0xb0] ss:$12 sps:$4 sm:$0xff]  }
  0x2f   :  { %258 = vmatprep.subr.bf16.mxu0 %v1113_v8  ;;  %v1137_v27 = vld [vmem:[%s1437_s0] sm:$0xff]   ;;  %v1141_v30 = vld [vmem:[#allocation4 + $0x48] sm:$0xff]   ;;  %v1144_v33 = vld [vmem:[#allocation4 + $0x50] sm:$0xff]   ;;  %v106_v52 = vshrl.u32 %v105_v51, 7  ;;  %vm879_vm1 = vcmask 56320  }
  0x30   :  { %v1139_v28 = vld [vmem:[#allocation4] sm:$0xff]   ;;  %v1142_v31 = vld [vmem:[#allocation4 + $0x8] sm:$0xff]   ;;  %v1145_v34 = vld [vmem:[#allocation4 + $0x10] sm:$0xff]  }
  0x31   :  { %1020 = vmatpush3.bf16.msra.mxu1 %v1116_v10  ;;  %v1140_v29 = vld [vmem:[#allocation4 + $0x80] sm:$0xff]   ;;  %v1143_v32 = vld [vmem:[#allocation4 + $0x88] sm:$0xff]   ;;  %v1146_v35 = vld [vmem:[#allocation4 + $0x90] sm:$0xff]   ;;  %v107_v53 = vsub.s32 0, %v106_v52  ;;  %v111_v55 = vsub.s32 1, %v106_v52  ;;  %v115_v56 = vsub.s32 2, %v106_v52 }
  0x32   :  { %259 = vmatpush1.bf16.msra.mxu0 %v1115_v9  ;;  %1021 = vmatprep.subr.bf16.mxu1 %v1232_v0  ;;  %v1147_v36 = vld [vmem:[#allocation4 + $0x58] sm:$0xff]   ;;  %v1150_v39 = vld [vmem:[#allocation4 + $0x60] sm:$0xff]   ;;  %v1153_v42 = vld [vmem:[#allocation4 + $0x68] sm:$0xff]  }
  0x33   :  { %260 = vmatprep.subr.bf16.mxu0 %v1117_v11  ;;  %v1148_v37 = vld [vmem:[#allocation4 + $0x18] sm:$0xff]   ;;  %v1151_v40 = vld [vmem:[#allocation4 + $0x20] sm:$0xff]   ;;  %v1154_v43 = vld [vmem:[#allocation4 + $0x28] sm:$0xff]  }
  0x34   :  { %v1149_v38 = vld [vmem:[#allocation4 + $0x98] sm:$0xff]   ;;  %v1152_v41 = vld [vmem:[#allocation4 + $0xa0] sm:$0xff]   ;;  %v1155_v44 = vld [vmem:[#allocation4 + $0xa8] sm:$0xff]  }
  0x35   :  { %1022 = vmatpush3.bf16.msra.mxu1 %v1120_v13  ;;  %v1156_v45 = vld [vmem:[#allocation4 + $0x70] sm:$0xff]   ;;  %v1159_v48 = vld [vmem:[#allocation4 + $0x78] sm:$0xff]   ;;  %v103_v54 = vld [vmem:[%s1440_s3] sm:$0x7] }
  0x36   :  { %261 = vmatpush1.bf16.msra.mxu0 %v1119_v12  ;;  %1023 = vmatprep.subr.bf16.mxu1 %v1232_v0  ;;  %v1157_v46 = vld [vmem:[#allocation4 + $0x30] sm:$0xff]   ;;  %v1160_v49 = vld [vmem:[#allocation4 + $0x38] sm:$0xff]   ;;  %v108_v57 = vrot.slane %v103_v54, %v107_v53  ;;  %v112_v58 = vrot.slane %v103_v54, %v111_v55  ;;  %v116_v59 = vrot.slane %v103_v54, %v115_v56  ;;  %v1175_v53 = vld [vmem:[%s1446_s9 + $0x28] sm:$0xff]  }
  0x37   :  { %262 = vmatprep.subr.bf16.mxu0 %v1121_v14  ;;  %v1158_v47 = vld [vmem:[#allocation4 + $0xb0] sm:$0xff]   ;;  %v1161_v50 = vld [vmem:[#allocation4 + $0xb8] sm:$0xff]  }
  0x38   :  { %v1176_v54 = vld [vmem:[%s1446_s9 + $0x30] sm:$0xff]   ;;  %v1177_v55 = vld [vmem:[%s1446_s9 + $0x38] sm:$0xff]  }
  0x39   :  { %1024 = vmatpush3.bf16.msra.mxu1 %v1124_v16 }
  0x3a   :  { %263 = vmatpush1.bf16.msra.mxu0 %v1123_v15  ;;  %1025 = vmatprep.subr.bf16.mxu1 %v1232_v0 }
  0x3b   :  { %264 = vmatprep.subr.bf16.mxu0 %v1125_v17 }
  0x3d   :  { %1026 = vmatpush3.bf16.msra.mxu1 %v1128_v19 }
  0x3e   :  { %265 = vmatpush1.bf16.msra.mxu0 %v1127_v18  ;;  %1027 = vmatprep.subr.bf16.mxu1 %v1232_v0 }
  0x3f   :  { %266 = vmatprep.subr.bf16.mxu0 %v1129_v20  ;;  %v1162_v20 = vld [vmem:[%s1443_s6] sm:$0xff]  }
  0x41   :  { %1028 = vmatpush3.bf16.msra.mxu1 %v1132_v22  ;;  %v1164_v22 = vld [vmem:[%s1443_s6 + $0x10] sm:$0xff]  }
  0x42   :  { %267 = vmatpush1.bf16.msra.mxu0 %v1131_v21  ;;  %1029 = vmatprep.subr.bf16.mxu1 %v1232_v0  ;;  %v1163_v21 = vld [vmem:[%s1443_s6 + $0x8] sm:$0xff]  }
  0x43   :  { %268 = vmatprep.subr.bf16.mxu0 %v1133_v23  ;;  %v1165_v23 = vld [vmem:[%s1443_s6 + $0x18] sm:$0xff]  }
  0x45   :  { %1030 = vmatpush3.bf16.msra.mxu1 %v1136_v25  ;;  %v1167_v25 = vld [vmem:[%s1443_s6 + $0x28] sm:$0xff]  }
  0x46   :  { %269 = vmatpush1.bf16.msra.mxu0 %v1135_v24  ;;  %1035 = vmatprep.subr.bf16.mxu1 %v1232_v0  ;;  %v1166_v24 = vld [vmem:[%s1443_s6 + $0x20] sm:$0xff]  }
  0x47   :  { %966 = vmatprep.subr.bf16.mxu0 %v1138_v26  ;;  %v1168_v26 = vld [vmem:[%s1443_s6 + $0x30] sm:$0xff]  }
  0x48   :  { %1032 = vmatmul.mubr.bf16.vlgmr.msra.gmra.mrb[0].mxu1 %v1137_v27 }
  0x49   :  { %287 = vmatmul.mubr.bf16.vlgmr.msra.gmra.mrb[0].mxu0 %v1137_v27  ;;  %1036 = vmatpush3.bf16.msra.mxu1 %v1140_v29  ;;  %v1169_v27 = vld [vmem:[%s1443_s6 + $0x38] sm:$0xff]   ;;  %v1170_v29 = vld [vmem:[%s1446_s9] sm:$0xff]  }
  0x4a   :  { %967 = vmatpush3.bf16.msra.mxu0 %v1139_v28  ;;  %1037 = vmatprep.subr.bf16.mxu1 %v1232_v0  ;;  %v69_v28 = vld [vmem:[%s1438_s1] sm:$0xff] }
  0x4b   :  { %968 = vmatprep.subr.bf16.mxu0 %v1141_v30  ;;  %1051 = vmatprep.mubr.msk.bf16.mxu1 %vm1234_vm0, %v1232_v0  ;;  %v70_v30 = vld [vmem:[%s1438_s1 + $0x8] sm:$0xff] }
  0x4c   :  { %650 = vperm.xlu0 %1104, %v69_v28  }
  0x4d   :  { %1038 = vmatpush3.bf16.msra.mxu1 %v1143_v32  ;;  %v1172_v32 = vld [vmem:[%s1446_s9 + $0x10] sm:$0xff]  }
  0x4e   :  { %969 = vmatpush3.bf16.msra.mxu0 %v1142_v31  ;;  %1039 = vmatprep.subr.bf16.mxu1 %v1232_v0  ;;  %v1171_v31 = vld [vmem:[%s1446_s9 + $0x8] sm:$0xff]  }
  0x4f   :  { %970 = vmatprep.subr.bf16.mxu0 %v1144_v33  ;;  %v1173_v33 = vld [vmem:[%s1446_s9 + $0x18] sm:$0xff]  }
  0x50   :  { %655 = vperm.xlu0 %1104, %v70_v30  }
  0x51   :  { %1040 = vmatpush3.bf16.msra.mxu1 %v1146_v35 }
  0x52   :  { %971 = vmatpush3.bf16.msra.mxu0 %v1145_v34  ;;  %1041 = vmatprep.subr.bf16.mxu1 %v1232_v0  ;;  %v1174_v34 = vld [vmem:[%s1446_s9 + $0x20] sm:$0xff]  }
  0x53   :  { %972 = vmatprep.subr.bf16.mxu0 %v1147_v36 }
  0x55   :  { %1042 = vmatpush3.bf16.msra.mxu1 %v1149_v38  ;;  %v913_v38 = vld [vmem:[%s1442_s5] ss:$0 sm:$0xff] }
  0x56   :  { %973 = vmatpush3.bf16.msra.mxu0 %v1148_v37  ;;  %1043 = vmatprep.subr.bf16.mxu1 %v1232_v0 }
  0x57   :  { %974 = vmatprep.subr.bf16.mxu0 %v1150_v39 }
  0x59   :  { %1044 = vmatpush3.bf16.msra.mxu1 %v1152_v41 }
  0x5a   :  { %975 = vmatpush3.bf16.msra.mxu0 %v1151_v40  ;;  %1045 = vmatprep.subr.bf16.mxu1 %v1232_v0 }
  0x5b   :  { %976 = vmatprep.subr.bf16.mxu0 %v1153_v42 }
  0x5d   :  { %1046 = vmatpush3.bf16.msra.mxu1 %v1155_v44 }
  0x5e   :  { %977 = vmatpush3.bf16.msra.mxu0 %v1154_v43  ;;  %1047 = vmatprep.subr.bf16.mxu1 %v1232_v0 }
  0x5f   :  { %978 = vmatprep.subr.bf16.mxu0 %v1156_v45 }
  0x61   :  { %1048 = vmatpush3.bf16.msra.mxu1 %v1158_v47 }
  0x62   :  { %979 = vmatpush3.bf16.msra.mxu0 %v1157_v46  ;;  %1049 = vmatprep.subr.bf16.mxu1 %v1232_v0 }
  0x63   :  { %980 = vmatprep.subr.bf16.mxu0 %v1159_v48 }
  0x65   :  { %1050 = vmatpush3.bf16.msra.mxu1 %v1161_v50 }
  0x66   :  { %981 = vmatpush3.bf16.msra.mxu0 %v1160_v49  ;;  %1075 = vmatprep.subr.bf16.mxu1 %v1232_v0 }
  0x67   :  { %1055 = vmatprep.subr.bf16.mxu0 %v1232_v0 }
  0xcb   :  { %v651_v56 = vpop.permute.xlu0 %650 }
 0x11b   :  { %v331_v63 = vpop.f32.mrb[0].mxu1 }
 0x11c   :  { %v288_v60 = vpop.f32.mrb[0].mxu0  ;;  %v332_v3 = vadd.f32 %v331_v63, %v116_v59  ;;  %v1033_v4 = vpop.f32.mrb[1].mxu1 }
 0x11d   :  { %v289_v61 = vadd.f32 %v288_v60, %v108_v57  ;;  %v290_v62 = vpop.f32.mrb[1].mxu0  ;;  %v334_v7 = vpop.f32.mrb[2].mxu1 }
 0x11e   :  { %v291_v1 = vadd.f32 %v290_v62, %v112_v58  ;;  %v292_v2 = vpop.f32.mrb[2].mxu0  ;;  %v340_v8 = vmax.f32 %v332_v3, 0.0  ;;  %v335_v10 = vadd.f32 %v334_v7, %v116_v59  ;;  %v1034_v11 = vpop.f32.mrb[3].mxu1 }
 0x11f   :  { %v293_v5 = vadd.f32 %v292_v2, %v108_v57  ;;  %v294_v6 = vpop.f32.mrb[3].mxu0  ;;  %v338_v12 = vmax.f32 %v289_v61, 0.0  ;;  %v938_v57 = vld [vmem:[%s1444_s7] ss:$0 sm:$0xff] }
 0x120   :  { %v295_v9 = vadd.f32 %v294_v6, %v112_v58  ;;  %v339_v14 = vmax.f32 %v291_v1, 0.0  ;;  %v343_v16 = vmax.f32 %v335_v10, 0.0  ;;  %v656_v58 = vpop.permute.xlu0 %655  ;;  %v664_v59 = vmul.f32 %v938_v57, %v651_v56  ;;  %v947_v61 = vld [vmem:[%s1445_s8] ss:$0 sm:$0xff] }
 0x121   :  { %v341_v13 = vmax.f32 %v293_v5, 0.0  ;;  %v665_v62 = vmul.f32 %v938_v57, %v656_v58 }
 0x122   :  { %v342_v15 = vmax.f32 %v295_v9, 0.0  ;;  %v346_v19 = vpack.c.bf16 %v343_v16, %v340_v8  ;;  %v948_v9 = vld [vmem:[%s1447_s10] ss:$0 sm:$0xff] }
 0x123   :  { %v344_v17 = vpack.c.bf16 %v341_v13, %v338_v12 }
 0x124   :  { %v345_v18 = vpack.c.bf16 %v342_v15, %v339_v14  ;;  %1052 = vmatmul.mubr.bf16.vlgmr.msra.gmra.mrb[4].mxu1 %v346_v19 }
 0x125   :  { %1091 = vmatprep.mubr.msk.bf16.mxu1 %vm1234_vm0, %v1232_v0  ;;  %1076 = vmatpush3.bf16.msra.mxu1 %v1170_v29 }
 0x126   :  { %578 = vmatprep.mubr.bf16.mxu0 %v345_v18  ;;  %1077 = vmatprep.subr.bf16.mxu1 %v1232_v0 }
 0x127   :  { %579 = vmatmul.mubr.bf16.vlgmr.msra.gmra.mrb[4].mxu0 %v344_v17 }
 0x128   :  { %1056 = vmatpush3.bf16.msra.mxu0 %v1162_v20  ;;  %1071 = vmatprep.mubr.msk.bf16.mxu0 %vm1234_vm0, %v1232_v0 }
 0x129   :  { %1057 = vmatprep.subr.bf16.mxu0 %v1232_v0  ;;  %1078 = vmatpush3.bf16.msra.mxu1 %v1171_v31 }
 0x12a   :  { %1079 = vmatprep.subr.bf16.mxu1 %v1232_v0 }
 0x12c   :  { %1058 = vmatpush3.bf16.msra.mxu0 %v1163_v21 }
 0x12d   :  { %1059 = vmatprep.subr.bf16.mxu0 %v1232_v0  ;;  %1080 = vmatpush3.bf16.msra.mxu1 %v1172_v32 }
 0x12e   :  { %1081 = vmatprep.subr.bf16.mxu1 %v1232_v0 }
 0x130   :  { %1060 = vmatpush3.bf16.msra.mxu0 %v1164_v22 }
 0x131   :  { %1061 = vmatprep.subr.bf16.mxu0 %v1232_v0  ;;  %1082 = vmatpush3.bf16.msra.mxu1 %v1173_v33 }
 0x132   :  { %1083 = vmatprep.subr.bf16.mxu1 %v1232_v0 }
 0x134   :  { %1062 = vmatpush3.bf16.msra.mxu0 %v1165_v23 }
 0x135   :  { %1063 = vmatprep.subr.bf16.mxu0 %v1232_v0  ;;  %1084 = vmatpush3.bf16.msra.mxu1 %v1174_v34 }
 0x136   :  { %1085 = vmatprep.subr.bf16.mxu1 %v1232_v0 }
 0x138   :  { %1064 = vmatpush3.bf16.msra.mxu0 %v1166_v24 }
 0x139   :  { %1065 = vmatprep.subr.bf16.mxu0 %v1232_v0  ;;  %1086 = vmatpush3.bf16.msra.mxu1 %v1175_v53 }
 0x13a   :  { %1087 = vmatprep.subr.bf16.mxu1 %v1232_v0 }
 0x13c   :  { %1066 = vmatpush3.bf16.msra.mxu0 %v1167_v25 }
 0x13d   :  { %1067 = vmatprep.subr.bf16.mxu0 %v1232_v0  ;;  %1088 = vmatpush3.bf16.msra.mxu1 %v1176_v54 }
 0x13e   :  { %1089 = vmatprep.subr.bf16.mxu1 %v1232_v0 }
 0x140   :  { %1068 = vmatpush3.bf16.msra.mxu0 %v1168_v26 }
 0x141   :  { %1069 = vmatprep.subr.bf16.mxu0 %v1232_v0  ;;  %1090 = vmatpush3.bf16.msra.mxu1 %v1177_v55 }
 0x144   :  { %1070 = vmatpush3.bf16.msra.mxu0 %v1169_v27 }
 0x1f7   :  { %v621_v35 = vpop.f32.mrb[4].mxu1 }
 0x1f8   :  { %v1053_v37 = vpop.f32.mrb[5].mxu1 }
 0x1f9   :  { %v624_v40 = vpop.f32.mrb[6].mxu1 }
 0x1fa   :  { %v982_v36 = vpop.f32.mrb[4].mxu0  ;;  %v1054_v43 = vpop.f32.mrb[7].mxu1 }
 0x1fb   :  { %v983_v39 = vpop.f32.mrb[5].mxu0 }
 0x1fc   :  { %v984_v41 = vadd.f32 %v983_v39, %v982_v36  ;;  %v985_v42 = vpop.f32.mrb[6].mxu0 }
 0x1fd   :  { %v986_v44 = vpop.f32.mrb[7].mxu0 }
 0x1fe   :  { %v581_v45 = vadd.f32 %v984_v41, %v913_v38  ;;  %v987_v46 = vadd.f32 %v986_v44, %v985_v42 }
 0x200   :  { %v622_v47 = vadd.f32 %v621_v35, %v581_v45  ;;  %v584_v48 = vadd.f32 %v987_v46, %v913_v38 }
 0x202   :  { %v625_v49 = vadd.f32 %v624_v40, %v584_v48  ;;  %v628_v50 = vmax.f32 %v622_v47, 0.0 }
 0x204   :  { %v629_v51 = vmax.f32 %v625_v49, 0.0 }
 0x206   :  { %v630_v52 = vpack.c.bf16 %v629_v51, %v628_v50 }
 0x208   :  { %1072 = vmatmul.mubr.bf16.vlgmr.msra.gmra.mrb[8].mxu0 %v630_v52 }
 0x2db   :  { %v748_v60 = vpop.f32.mrb[8].mxu0 }
 0x2dc   :  { %v749_v63 = vadd.f32 %v748_v60, %v664_v59  ;;  %v1073_v0 = vpop.f32.mrb[9].mxu0 }
 0x2dd   :  { %v751_v1 = vpop.f32.mrb[10].mxu0 }
 0x2de   :  { %v762_v2 = vadd.f32 %v947_v61, %v749_v63  ;;  %v752_v3 = vadd.f32 %v751_v1, %v665_v62  ;;  %v1074_v4 = vpop.f32.mrb[11].mxu0 }
 0x2e0   :  { %v763_v5 = vadd.f32 %v947_v61, %v752_v3  ;;  %v764_v6 = vmax.f32 %v762_v2, 0.0 }
 0x2e2   :  { %v765_v7 = vmax.f32 %v763_v5, 0.0 }
 0x2e4   :  { %v766_v8 = vpack.c.bf16 %v765_v7, %v764_v6 }
 0x2e6   :  { %1092 = vmatmul.mubr.bf16.vlgmr.msra.gmra.mrb[8].mxu1 %v766_v8 }
 0x3b9   :  { %v872_v10 = vpop.f32.mrb[8].mxu1 }
 0x3ba   :  { %v873_v11 = vadd.f32 %v948_v9, %v872_v10  ;;  %v1093_v12 = vpop.f32.mrb[9].mxu1 }
 0x3bb   :  { %v875_v13 = vpop.f32.mrb[10].mxu1 }
 0x3bc   :  { %880 = vst.msk [vmem:[%s1448_s11] sm:$0xff] %vm879_vm1, %v873_v11  ;;  %v876_v14 = vadd.f32 %v948_v9, %v875_v13  ;;  %v1094_v15 = vpop.f32.mrb[11].mxu1 }
 0x3be   :  { %881 = vst.msk [vmem:[%s1448_s11 + $0x8] sm:$0xff] %vm879_vm1, %v876_v14 }
 0x3bf   :  { %886 = vsyncpa [#allocation3], 1 }
 0x3c0   :  { %887 = vsyncpa [#allocation5], 1 }

</bundles_post_ra>
